<compile_context>
chip_gen: v5e
topology: v5e:2x2
jax: 0.10.0
libtpu: 0.0.40
codegen_flags: <defaults>
</compile_context>

<pallas_src>
import functools

import jax
import jax.numpy as jnp
from jax.experimental import pallas as pl
from jax.experimental.pallas import tpu as pltpu

HIDDEN = 128
LATENT = 32
LATENT_PAD = 128          # latent padded to a full lane width (zeros) — exact
LANE = 128
_INTERNAL_SCRATCH = 2 * 1024 * 1024   # headroom for Mosaic internal scratch


def _round_up(v, m):
    return (v + m - 1) // m * m


def _cdiv(a, b):
    return (a + b - 1) // b


def _vmem_budget():
    """Generation-aware VMEM budget: ~75% of physical capacity.

    v5e/v6e have 128 MiB (-> ~96 MiB budget), v7x has 64 MiB (-> ~48 MiB).
    Falls back to a v7x-safe 48 MiB if the query is unavailable.
    """
    try:
        cap = pltpu.get_tpu_info().vmem_capacity_bytes
    except Exception:
        cap = 64 * 1024 * 1024
    return int(cap) * 3 // 4


def _vmem_estimate(tb, dp):
    """VMEM footprint (bytes) for one grid step.

    x/out tiles are double-buffered by the pipeline; the weights/biases are
    single-buffered (pl.Buffered(1)); temps cover h1/z/h2 and the (tb, dp)
    f32 result before the output store; plus internal scratch headroom.
    """
    acts = 2 * 2 * tb * dp * 4                                   # x + out tiles
    wts = (dp * HIDDEN + HIDDEN * LATENT_PAD
           + LATENT_PAD * HIDDEN + HIDDEN * dp
           + 2 * HIDDEN + LATENT_PAD + dp) * 4                   # single-buffered
    temps = (3 * tb * HIDDEN + tb * dp) * 4                      # h1, z, h2, y
    return acts + wts + temps + _INTERNAL_SCRATCH


def _autoencoder_kernel(x_ref, w1_ref, b1_ref, w2_ref, b2_ref,
                        w3_ref, b3_ref, w4_ref, b4_ref, out_ref):
    """Whole forward pass for one batch-tile, fused in VMEM.

    x_ref : (TB, Dp)     w1 : (Dp, 128)        b1 : (1, 128)
                         w2 : (128, 128pad)    b2 : (1, 128pad)
                         w3 : (128pad, 128)    b3 : (1, 128)
                         w4 : (128, Dp)        b4 : (1, Dp)
    out_ref : (TB, Dp)
    """
    x = x_ref[...]

    # encoder
    h1 = jnp.dot(x, w1_ref[...], preferred_element_type=jnp.float32) + b1_ref[...]
    h1 = jnp.maximum(h1, 0.0)
    z = jnp.dot(h1, w2_ref[...], preferred_element_type=jnp.float32) + b2_ref[...]

    # decoder
    h2 = jnp.dot(z, w3_ref[...], preferred_element_type=jnp.float32) + b3_ref[...]
    h2 = jnp.maximum(h2, 0.0)
    y = jnp.dot(h2, w4_ref[...], preferred_element_type=jnp.float32) + b4_ref[...]

    out_ref[...] = y.astype(out_ref.dtype)


@functools.partial(jax.jit, static_argnames=("tb_max",))
def autoencoder_forward(x, params, *, tb_max=1024):
    """x: (B, D) float32. params: pre-padded dict (see prepare_params)."""
    B, D = x.shape
    w1, b1, w2, b2, w3, b3, w4, b4 = (
        params["w1"], params["b1"], params["w2"], params["b2"],
        params["w3"], params["b3"], params["w4"], params["b4"],
    )
    Dp = w1.shape[0]
    assert Dp == _round_up(D, LANE), "call prepare_params() once before the forward"

    # Pad x's feature dim only when D is not already lane-dense (zeros => exact).
    if Dp != D:
        x = jnp.pad(x, ((0, 0), (0, Dp - D)))

    # --- batch tile selection (no batch padding: ragged last tile is fine) ---
    vmem_budget = _vmem_budget()
    if B <= LANE:
        tb = B                       # block dim == full array dim -> always legal
    else:
        tb = (min(tb_max, B) // LANE) * LANE       # multiple of 128, <= B
        if B >= 2 * LANE:
            # >= 2 grid steps so the "parallel" axis shards across v7x's 2 TCs.
            tb = min(tb, _round_up(_cdiv(B, 2), LANE))
        while tb > LANE and _vmem_estimate(tb, Dp) > vmem_budget:
            tb = max(LANE, _round_up(tb // 2, LANE))
    num_tiles = _cdiv(B, tb)

    # Weights/biases are grid-invariant: load whole, single-buffered.
    resident = lambda shape: pl.BlockSpec(
        shape, lambda i: (0,) * len(shape), pipeline_mode=pl.Buffered(1))

    grid_spec = pltpu.PrefetchScalarGridSpec(
        num_scalar_prefetch=0,
        grid=(num_tiles,),
        in_specs=[
            pl.BlockSpec((tb, Dp), lambda i: (i, 0)),   # x batch tile
            resident(w1.shape), resident(b1.shape),
            resident(w2.shape), resident(b2.shape),
            resident(w3.shape), resident(b3.shape),
            resident(w4.shape), resident(b4.shape),
        ],
        out_specs=pl.BlockSpec((tb, Dp), lambda i: (i, 0)),
    )

    out = pl.pallas_call(
        _autoencoder_kernel,
        out_shape=jax.ShapeDtypeStruct((B, Dp), x.dtype),
        grid_spec=grid_spec,
        compiler_params=pltpu.CompilerParams(
            dimension_semantics=("parallel",),
            vmem_limit_bytes=vmem_budget,
        ),
    )(x, w1, b1, w2, b2, w3, b3, w4, b4)

    return out[:, :D] if Dp != D else out


def init_params(key, input_dim):
    """Deterministic synthetic parameters matching nn.Linear shapes.

    PyTorch Linear(in, out) has weight (out, in); we store the transpose
    (in, out) so the kernel does x @ W. Biases stored as (1, out).
    """
    ks = jax.random.split(key, 8)

    def lin(kw, kb, fan_in, fan_out):
        bound = 1.0 / jnp.sqrt(fan_in)
        w = jax.random.uniform(kw, (fan_in, fan_out), jnp.float32, -bound, bound)
        b = jax.random.uniform(kb, (1, fan_out), jnp.float32, -bound, bound)
        return w, b

    w1, b1 = lin(ks[0], ks[1], input_dim, HIDDEN)   # encoder[0]
    w2, b2 = lin(ks[2], ks[3], HIDDEN, LATENT)      # encoder[2]
    w3, b3 = lin(ks[4], ks[5], LATENT, HIDDEN)      # decoder[0]
    w4, b4 = lin(ks[6], ks[7], HIDDEN, input_dim)   # decoder[2]
    return dict(w1=w1, b1=b1, w2=w2, b2=b2, w3=w3, b3=b3, w4=w4, b4=b4)


def prepare_params(params, input_dim):
    """One-time zero-padding of weights to lane-dense kernel shapes (exact).

    Hoisted out of the jitted forward so the big (Dp,128)/(128,Dp) slabs are
    not re-copied through HBM on every call.
    """
    dp = _round_up(input_dim, LANE)
    p = dict(params)
    p["w1"] = jnp.pad(params["w1"], ((0, dp - input_dim), (0, 0)))
    p["w4"] = jnp.pad(params["w4"], ((0, 0), (0, dp - input_dim)))
    p["b4"] = jnp.pad(params["b4"], ((0, 0), (0, dp - input_dim)))
    p["w2"] = jnp.pad(params["w2"], ((0, 0), (0, LATENT_PAD - LATENT)))
    p["b2"] = jnp.pad(params["b2"], ((0, 0), (0, LATENT_PAD - LATENT)))
    p["w3"] = jnp.pad(params["w3"], ((0, LATENT_PAD - LATENT), (0, 0)))
    return p


def reference_forward(x, p):
    """Plain-JAX reference of the PyTorch forward pass (unpadded params)."""
    h1 = jnp.maximum(x @ p["w1"] + p["b1"], 0.0)
    z = h1 @ p["w2"] + p["b2"]
    h2 = jnp.maximum(z @ p["w3"] + p["b3"], 0.0)
    return h2 @ p["w4"] + p["b4"]


if __name__ == "__main__":
    key = jax.random.PRNGKey(0)
    k_x, k_p = jax.random.split(key)

    batch, input_dim = 8, 256          # (batch_size, input_dim) like the PyTorch module
    x = jax.random.normal(k_x, (batch, input_dim), jnp.float32)
    params = init_params(k_p, input_dim)
    padded_params = prepare_params(params, input_dim)   # one-time pad, outside the forward

    out = autoencoder_forward(x, padded_params)
    out = jax.block_until_ready(out)

    ref = reference_forward(x, params)
    assert out.shape == x.shape and out.dtype == x.dtype
    assert jnp.allclose(out, ref, atol=1e-4, rtol=1e-4), "mismatch vs JAX reference"

    print("KERNEL_OK")
</pallas_src>

<mosaic_0001>
module attributes {stable_mosaic.version = 11 : i64} {
  func.func @_autoencoder_kernel(%arg0: i32, %arg1: memref<8x256xf32, #tpu.memory_space<vmem>>, %arg2: memref<256x128xf32, #tpu.memory_space<vmem>>, %arg3: memref<1x128xf32, #tpu.memory_space<vmem>>, %arg4: memref<128x128xf32, #tpu.memory_space<vmem>>, %arg5: memref<1x128xf32, #tpu.memory_space<vmem>>, %arg6: memref<128x128xf32, #tpu.memory_space<vmem>>, %arg7: memref<1x128xf32, #tpu.memory_space<vmem>>, %arg8: memref<128x256xf32, #tpu.memory_space<vmem>>, %arg9: memref<1x256xf32, #tpu.memory_space<vmem>>, %arg10: memref<8x256xf32, #tpu.memory_space<vmem>>) attributes {dimension_semantics = [#tpu.dimension_semantics<parallel>], iteration_bounds = array<i64: 1>, scalar_prefetch = 0 : i64, scratch_operands = 0 : i64, tpu.core_type = #tpu.core_type<tc>, window_params = [{transform_indices = @transform_0, window_bounds = array<i64: 8, 256>}, {pipeline_mode = #tpu.pipeline_mode<synchronous>, transform_indices = @transform_1, window_bounds = array<i64: 256, 128>}, {pipeline_mode = #tpu.pipeline_mode<synchronous>, transform_indices = @transform_2, window_bounds = array<i64: 1, 128>}, {pipeline_mode = #tpu.pipeline_mode<synchronous>, transform_indices = @transform_3, window_bounds = array<i64: 128, 128>}, {pipeline_mode = #tpu.pipeline_mode<synchronous>, transform_indices = @transform_4, window_bounds = array<i64: 1, 128>}, {pipeline_mode = #tpu.pipeline_mode<synchronous>, transform_indices = @transform_5, window_bounds = array<i64: 128, 128>}, {pipeline_mode = #tpu.pipeline_mode<synchronous>, transform_indices = @transform_6, window_bounds = array<i64: 1, 128>}, {pipeline_mode = #tpu.pipeline_mode<synchronous>, transform_indices = @transform_7, window_bounds = array<i64: 128, 256>}, {pipeline_mode = #tpu.pipeline_mode<synchronous>, transform_indices = @transform_8, window_bounds = array<i64: 1, 256>}, {transform_indices = @transform_9, window_bounds = array<i64: 8, 256>}]} {
    %c0 = arith.constant 0 : index
    %c0_0 = arith.constant 0 : index
    %0 = vector.load %arg1[%c0, %c0_0] : memref<8x256xf32, #tpu.memory_space<vmem>>, vector<8x256xf32>
    %c0_1 = arith.constant 0 : index
    %c0_2 = arith.constant 0 : index
    %1 = vector.load %arg2[%c0_1, %c0_2] : memref<256x128xf32, #tpu.memory_space<vmem>>, vector<256x128xf32>
    %cst = arith.constant dense<0.000000e+00> : vector<8x128xf32>
    %2 = tpu.matmul %0, %1, %cst {dimension_numbers = #tpu.dot_dimension_numbers<[1], [0], [0], [1], [0, 0, 1, 1], [], []>} : vector<8x256xf32>, vector<256x128xf32>, vector<8x128xf32> -> vector<8x128xf32>
    %c0_3 = arith.constant 0 : index
    %c0_4 = arith.constant 0 : index
    %3 = vector.load %arg3[%c0_3, %c0_4] : memref<1x128xf32, #tpu.memory_space<vmem>>, vector<1x128xf32>
    %4 = vector.broadcast %3 : vector<1x128xf32> to vector<8x128xf32>
    %5 = arith.addf %2, %4 : vector<8x128xf32>
    %cst_5 = arith.constant 0.000000e+00 : f32
    %6 = vector.broadcast %cst_5 : f32 to vector<8x128xf32>
    %7 = arith.maximumf %5, %6 : vector<8x128xf32>
    %c0_6 = arith.constant 0 : index
    %c0_7 = arith.constant 0 : index
    %8 = vector.load %arg4[%c0_6, %c0_7] : memref<128x128xf32, #tpu.memory_space<vmem>>, vector<128x128xf32>
    %cst_8 = arith.constant dense<0.000000e+00> : vector<8x128xf32>
    %9 = tpu.matmul %7, %8, %cst_8 {dimension_numbers = #tpu.dot_dimension_numbers<[1], [0], [0], [1], [0, 0, 1, 1], [], []>} : vector<8x128xf32>, vector<128x128xf32>, vector<8x128xf32> -> vector<8x128xf32>
    %c0_9 = arith.constant 0 : index
    %c0_10 = arith.constant 0 : index
    %10 = vector.load %arg5[%c0_9, %c0_10] : memref<1x128xf32, #tpu.memory_space<vmem>>, vector<1x128xf32>
    %11 = vector.broadcast %10 : vector<1x128xf32> to vector<8x128xf32>
    %12 = arith.addf %9, %11 : vector<8x128xf32>
    %c0_11 = arith.constant 0 : index
    %c0_12 = arith.constant 0 : index
    %13 = vector.load %arg6[%c0_11, %c0_12] : memref<128x128xf32, #tpu.memory_space<vmem>>, vector<128x128xf32>
    %cst_13 = arith.constant dense<0.000000e+00> : vector<8x128xf32>
    %14 = tpu.matmul %12, %13, %cst_13 {dimension_numbers = #tpu.dot_dimension_numbers<[1], [0], [0], [1], [0, 0, 1, 1], [], []>} : vector<8x128xf32>, vector<128x128xf32>, vector<8x128xf32> -> vector<8x128xf32>
    %c0_14 = arith.constant 0 : index
    %c0_15 = arith.constant 0 : index
    %15 = vector.load %arg7[%c0_14, %c0_15] : memref<1x128xf32, #tpu.memory_space<vmem>>, vector<1x128xf32>
    %16 = vector.broadcast %15 : vector<1x128xf32> to vector<8x128xf32>
    %17 = arith.addf %14, %16 : vector<8x128xf32>
    %cst_16 = arith.constant 0.000000e+00 : f32
    %18 = vector.broadcast %cst_16 : f32 to vector<8x128xf32>
    %19 = arith.maximumf %17, %18 : vector<8x128xf32>
    %c0_17 = arith.constant 0 : index
    %c0_18 = arith.constant 0 : index
    %20 = vector.load %arg8[%c0_17, %c0_18] : memref<128x256xf32, #tpu.memory_space<vmem>>, vector<128x256xf32>
    %cst_19 = arith.constant dense<0.000000e+00> : vector<8x256xf32>
    %21 = tpu.matmul %19, %20, %cst_19 {dimension_numbers = #tpu.dot_dimension_numbers<[1], [0], [0], [1], [0, 0, 1, 1], [], []>} : vector<8x128xf32>, vector<128x256xf32>, vector<8x256xf32> -> vector<8x256xf32>
    %c0_20 = arith.constant 0 : index
    %c0_21 = arith.constant 0 : index
    %22 = vector.load %arg9[%c0_20, %c0_21] : memref<1x256xf32, #tpu.memory_space<vmem>>, vector<1x256xf32>
    %23 = vector.broadcast %22 : vector<1x256xf32> to vector<8x256xf32>
    %24 = arith.addf %21, %23 : vector<8x256xf32>
    %c0_22 = arith.constant 0 : index
    %c0_23 = arith.constant 0 : index
    %25 = vector.load %arg10[%c0_22, %c0_23] : memref<8x256xf32, #tpu.memory_space<vmem>>, vector<8x256xf32>
    tpu.vector_store %arg10[%c0_22, %c0_23], %24 {strides = array<i32>} : memref<8x256xf32, #tpu.memory_space<vmem>>, vector<8x256xf32>,
    return
  }
  func.func @transform_0(%arg0: i32) -> (i32, i32) {
    %c0_i32 = arith.constant 0 : i32
    %c0_i32_0 = arith.constant 0 : i32
    return %arg0, %c0_i32 : i32, i32
  }
  func.func @transform_1(%arg0: i32) -> (i32, i32) {
    %c0_i32 = arith.constant 0 : i32
    %c0_i32_0 = arith.constant 0 : i32
    %c0_i32_1 = arith.constant 0 : i32
    return %c0_i32, %c0_i32_0 : i32, i32
  }
  func.func @transform_2(%arg0: i32) -> (i32, i32) {
    %c0_i32 = arith.constant 0 : i32
    %c0_i32_0 = arith.constant 0 : i32
    %c0_i32_1 = arith.constant 0 : i32
    return %c0_i32, %c0_i32_0 : i32, i32
  }
  func.func @transform_3(%arg0: i32) -> (i32, i32) {
    %c0_i32 = arith.constant 0 : i32
    %c0_i32_0 = arith.constant 0 : i32
    %c0_i32_1 = arith.constant 0 : i32
    return %c0_i32, %c0_i32_0 : i32, i32
  }
  func.func @transform_4(%arg0: i32) -> (i32, i32) {
    %c0_i32 = arith.constant 0 : i32
    %c0_i32_0 = arith.constant 0 : i32
    %c0_i32_1 = arith.constant 0 : i32
    return %c0_i32, %c0_i32_0 : i32, i32
  }
  func.func @transform_5(%arg0: i32) -> (i32, i32) {
    %c0_i32 = arith.constant 0 : i32
    %c0_i32_0 = arith.constant 0 : i32
    %c0_i32_1 = arith.constant 0 : i32
    return %c0_i32, %c0_i32_0 : i32, i32
  }
  func.func @transform_6(%arg0: i32) -> (i32, i32) {
    %c0_i32 = arith.constant 0 : i32
    %c0_i32_0 = arith.constant 0 : i32
    %c0_i32_1 = arith.constant 0 : i32
    return %c0_i32, %c0_i32_0 : i32, i32
  }
  func.func @transform_7(%arg0: i32) -> (i32, i32) {
    %c0_i32 = arith.constant 0 : i32
    %c0_i32_0 = arith.constant 0 : i32
    %c0_i32_1 = arith.constant 0 : i32
    return %c0_i32, %c0_i32_0 : i32, i32
  }
  func.func @transform_8(%arg0: i32) -> (i32, i32) {
    %c0_i32 = arith.constant 0 : i32
    %c0_i32_0 = arith.constant 0 : i32
    %c0_i32_1 = arith.constant 0 : i32
    return %c0_i32, %c0_i32_0 : i32, i32
  }
  func.func @transform_9(%arg0: i32) -> (i32, i32) {
    %c0_i32 = arith.constant 0 : i32
    %c0_i32_0 = arith.constant 0 : i32
    return %arg0, %c0_i32 : i32, i32
  }
}

</mosaic_0001>

<bundles_post_ra>
// kernel: autoencoder_forward.1
= control target key start
LH: loop header
LB: loop body
LE: loop exit
PB: predicated region body
PF: predicated region fallthrough
CT: control target
= control target key end

     0   :  { %14 = vsyncpa [#allocation3], 0  ;;  %s714_s0 = inlined_call_operand.hbm [shape: f32[8,256], index: 0, kind: input, shape index: {}]   ;;  %s715_s1 = inlined_call_operand.hbm [shape: f32[256,128], index: 1, kind: input, shape index: {}]   ;;  %s716_s2 = inlined_call_operand.hbm [shape: f32[1,128], index: 2, kind: input, shape index: {}]   ;;  %s717_s3 = inlined_call_operand.hbm [shape: f32[128,128], index: 3, kind: input, shape index: {}]   ;;  %s718_s4 = inlined_call_operand.vmem [shape: f32[1,128], index: 4, kind: input, shape index: {}]   ;;  %s719_s5 = inlined_call_operand.hbm [shape: f32[128,128], index: 5, kind: input, shape index: {}]   ;;  %s720_s6 = inlined_call_operand.hbm [shape: f32[1,128], index: 6, kind: input, shape index: {}]   ;;  %s721_s7 = inlined_call_operand.hbm [shape: f32[128,256], index: 7, kind: input, shape index: {}]   ;;  %s722_s8 = inlined_call_operand.vmem [shape: f32[1,256], index: 8, kind: input, shape index: {}]   ;;  %s723_s9 = inlined_call_operand.hbm [shape: f32[8,256], index: 9, kind: output, shape index: {}]  }
   0x1   :  { %15 = vsyncpa [#allocation6], 0 }
   0x2   :  { %16 = vsyncpa [#allocation9], 0 }
   0x3   :  { %17 = vsyncpa [#allocation12], 0  ;;  %s34_s11 = sshll.u32 %s715_s1, 4  ;;  %s35_s11 = int_to_ptr.hbm [resolvable:$true] %s34_s11 }
   0x4   :  { %18 = vsyncpa [#allocation4], 0  ;;  %s613_s12 = smov [#allocation5]   ;;  %s58_s16 = sshll.u32 %s717_s3, 4  ;;  %s59_s16 = int_to_ptr.hbm [resolvable:$true] %s58_s16 }
   0x5   :  { %s36_s13 = sshll.u32 %s613_s12, 4  ;;  %s614_s17 = smov 128   ;;  %s37_s13 = int_to_ptr.vmem [resolvable:$true] %s36_s13 }
   0x6   :  { %s615_s18 = smov 8   ;;  %s616_s19 = smov [#allocation8]  }
   0x7   :  { %42 = dma.hbm_to_vmem [thread:$0]  %s35_s11, 4096, %s37_s13, [#allocation6], %s614_s17, %s614_s17, %s615_s18  }
   0x8   :  { %s60_s20 = sshll.u32 %s616_s19, 4  ;;  %s87_s22 = sshll.u32 %s720_s6, 4  ;;  %s61_s20 = int_to_ptr.vmem [resolvable:$true] %s60_s20  ;;  %s88_s22 = int_to_ptr.hbm [resolvable:$true] %s87_s22 }
   0x9   :  { %66 = dma.hbm_to_vmem [thread:$0]  %s59_s16, 2048, %s61_s20, [#allocation9], %s614_s17, %s614_s17, %s615_s18  }
   0xa   :  { %s24_s24 = sshll.u32 %s714_s0, 4  ;;  %s617_s25 = smov [#allocation11]   ;;  %s25_s24 = int_to_ptr.hbm [resolvable:$true] %s24_s24 }
   0xb   :  { %s89_s26 = sshll.u32 %s617_s25, 4  ;;  %s618_s27 = smov [#allocation2]   ;;  %s90_s26 = int_to_ptr.vmem [resolvable:$true] %s89_s26 }
   0xc   :  { %92 = dma.hbm_to_vmem [thread:$0]  %s88_s22, 16, %s90_s26, [#allocation12]  }
   0xd   :  { %s26_s28 = sshll.u32 %s618_s27, 4  ;;  %s48_s6 = sshll.u32 %s716_s2, 4  ;;  %s27_s28 = int_to_ptr.vmem [resolvable:$true] %s26_s28  ;;  %s49_s6 = int_to_ptr.hbm [resolvable:$true] %s48_s6 }
   0xe   :  { %29 = dma.hbm_to_vmem [thread:$0]  %s25_s24, 256, %s27_s28, [#allocation3]  }
   0xf   :  { %s73_s12 = sshll.u32 %s719_s5, 4  ;;  %s619_s13 = smov [#allocation7]   ;;  %s74_s12 = int_to_ptr.hbm [resolvable:$true] %s73_s12 }
  0x10   :  { %s50_s0 = sshll.u32 %s619_s13, 4  ;;  %s620_s14 = smov [#allocation10]   ;;  %s51_s0 = int_to_ptr.vmem [resolvable:$true] %s50_s0 }
  0x11   :  { %53 = dma.hbm_to_vmem [thread:$0]  %s49_s6, 16, %s51_s0, [#allocation6]  }
  0x12   :  { %s75_s15 = sshll.u32 %s620_s14, 4  ;;  %s97_s20 = sshll.u32 %s721_s7, 4  ;;  %s76_s15 = int_to_ptr.vmem [resolvable:$true] %s75_s15  ;;  %s98_s20 = int_to_ptr.hbm [resolvable:$true] %s97_s20 }
  0x13   :  { %81 = dma.hbm_to_vmem [thread:$0]  %s74_s12, 2048, %s76_s15, [#allocation9], %s614_s17, %s614_s17, %s615_s18  }
  0x14   :  { %s621_s2 = smov [#allocation13]   ;;  %s622_s5 = smov 256  }
  0x15   :  { %s99_s21 = sshll.u32 %s621_s2, 4  ;;  %s623_s1 = smov 16   ;;  %s100_s21 = int_to_ptr.vmem [resolvable:$true] %s99_s21 }
  0x16   :  { %105 = dma.hbm_to_vmem [thread:$0]  %s98_s20, 4096, %s100_s21, [#allocation12], %s622_s5, %s622_s5, %s623_s1  }
  0x17   :  { %603 = dma.done.wait [#allocation3], 256  }
  0x18   :  { %604 = vsyncadd [#allocation3], 4294967040 }
  0x19   :  { %605 = dma.done.wait [#allocation6], 4112  }
  0x1a   :  { %606 = vsyncadd [#allocation6], 4294963184 }
  0x1b   :  { %607 = dma.done.wait [#allocation9], 4096  }
  0x1c   :  { %608 = vsyncadd [#allocation9], 4294963200 }
  0x1d   :  { %609 = dma.done.wait [#allocation12], 4112  }
  0x1e   :  { %610 = vsyncadd [#allocation12], 4294963184  ;;  %v153_v0 = vld [vmem:[#allocation5 + $0x78] sm:$0xff]  ;;  %v152_v1 = vld [vmem:[#allocation5 + $0x70] sm:$0xff]  ;;  %s624_s22 = smov [#allocation14]   ;;  %s383_s25 = sshll.u32 %s723_s9, 4  ;;  %s384_s25 = int_to_ptr.hbm [resolvable:$true] %s383_s25 }
  0x1f   :  { %v169_v2 = vld [vmem:[#allocation5 + $0xf8] sm:$0xff]  ;;  %174 = vmatpush.msra.mxu0 %v153_v0  ;;  %v168_v3 = vld [vmem:[#allocation5 + $0xf0] sm:$0xff]  ;;  %v151_v4 = vld [vmem:[#allocation5 + $0x68] sm:$0xff]  ;;  %s381_s3 = sshll.u32 %s624_s22, 4  ;;  %s382_s3 = int_to_ptr.vmem [resolvable:$true] %s381_s3 }
  0x20   :  { %194 = vmatpush.msra.mxu1 %v169_v2  ;;  %v167_v5 = vld [vmem:[#allocation5 + $0xe8] sm:$0xff]  ;;  %v150_v6 = vld [vmem:[#allocation5 + $0x60] sm:$0xff]  ;;  %v149_v8 = vld [vmem:[#allocation5 + $0x58] sm:$0xff] }
  0x21   :  { %175 = vmatpush.msra.mxu0 %v152_v1  ;;  %v166_v7 = vld [vmem:[#allocation5 + $0xe0] sm:$0xff]  ;;  %v165_v9 = vld [vmem:[#allocation5 + $0xd8] sm:$0xff]  ;;  %v148_v10 = vld [vmem:[#allocation5 + $0x50] sm:$0xff] }
  0x22   :  { %195 = vmatpush.msra.mxu1 %v168_v3  ;;  %v164_v11 = vld [vmem:[#allocation5 + $0xd0] sm:$0xff]  ;;  %v147_v12 = vld [vmem:[#allocation5 + $0x48] sm:$0xff]  ;;  %v230_v14 = vld [vmem:[#allocation8 + $0x78] sm:$0xff] }
  0x23   :  { %176 = vmatpush.msra.mxu0 %v151_v4  ;;  %v163_v13 = vld [vmem:[#allocation5 + $0xc8] sm:$0xff]  ;;  %v229_v15 = vld [vmem:[#allocation8 + $0x70] sm:$0xff]  ;;  %v146_v16 = vld [vmem:[#allocation5 + $0x40] sm:$0xff]  ;;  %235 = vmatpush.msra.mxu2 %v230_v14 }
  0x24   :  { %196 = vmatpush.msra.mxu1 %v167_v5  ;;  %v162_v17 = vld [vmem:[#allocation5 + $0xc0] sm:$0xff]  ;;  %v228_v18 = vld [vmem:[#allocation8 + $0x68] sm:$0xff]  ;;  %v145_v19 = vld [vmem:[#allocation5 + $0x38] sm:$0xff] }
  0x25   :  { %177 = vmatpush.msra.mxu0 %v150_v6  ;;  %v161_v20 = vld [vmem:[#allocation5 + $0xb8] sm:$0xff]  ;;  %236 = vmatpush.msra.mxu2 %v229_v15  ;;  %v144_v21 = vld [vmem:[#allocation5 + $0x30] sm:$0xff]  ;;  %v227_v22 = vld [vmem:[#allocation8 + $0x60] sm:$0xff] }
  0x26   :  { %197 = vmatpush.msra.mxu1 %v166_v7  ;;  %v160_v23 = vld [vmem:[#allocation5 + $0xb0] sm:$0xff]  ;;  %v226_v24 = vld [vmem:[#allocation8 + $0x58] sm:$0xff]  ;;  %v143_v25 = vld [vmem:[#allocation5 + $0x28] sm:$0xff] }
  0x27   :  { %178 = vmatpush.msra.mxu0 %v149_v8  ;;  %237 = vmatpush.msra.mxu2 %v228_v18  ;;  %v159_v26 = vld [vmem:[#allocation5 + $0xa8] sm:$0xff]  ;;  %v225_v27 = vld [vmem:[#allocation8 + $0x50] sm:$0xff]  ;;  %v142_v28 = vld [vmem:[#allocation5 + $0x20] sm:$0xff] }
  0x28   :  { %198 = vmatpush.msra.mxu1 %v165_v9  ;;  %v158_v29 = vld [vmem:[#allocation5 + $0xa0] sm:$0xff]  ;;  %v224_v30 = vld [vmem:[#allocation8 + $0x48] sm:$0xff]  ;;  %v141_v31 = vld [vmem:[#allocation5 + $0x18] sm:$0xff] }
  0x29   :  { %179 = vmatpush.msra.mxu0 %v148_v10  ;;  %238 = vmatpush.msra.mxu2 %v227_v22  ;;  %v157_v32 = vld [vmem:[#allocation5 + $0x98] sm:$0xff]  ;;  %v223_v33 = vld [vmem:[#allocation8 + $0x40] sm:$0xff]  ;;  %v140_v34 = vld [vmem:[#allocation5 + $0x10] sm:$0xff] }
  0x2a   :  { %199 = vmatpush.msra.mxu1 %v164_v11  ;;  %v156_v35 = vld [vmem:[#allocation5 + $0x90] sm:$0xff]  ;;  %v222_v36 = vld [vmem:[#allocation8 + $0x38] sm:$0xff]  ;;  %v139_v37 = vld [vmem:[#allocation5 + $0x8] sm:$0xff] }
  0x2b   :  { %180 = vmatpush.msra.mxu0 %v147_v12  ;;  %239 = vmatpush.msra.mxu2 %v226_v24  ;;  %v155_v38 = vld [vmem:[#allocation5 + $0x88] sm:$0xff]  ;;  %v221_v39 = vld [vmem:[#allocation8 + $0x30] sm:$0xff]  ;;  %v138_v40 = vld [vmem:[#allocation5] sm:$0xff] }
  0x2c   :  { %200 = vmatpush.msra.mxu1 %v163_v13  ;;  %v154_v41 = vld [vmem:[#allocation5 + $0x80] sm:$0xff]  ;;  %v136_v42 = vld [vmem:[#allocation2] sm:$0xff]  ;;  %v137_v43 = vld [vmem:[#allocation2 + $0x8] sm:$0xff] }
  0x2d   :  { %181 = vmatpush.msra.mxu0 %v146_v16  ;;  %240 = vmatpush.msra.mxu2 %v225_v27  ;;  %v220_v44 = vld [vmem:[#allocation8 + $0x28] sm:$0xff]  ;;  %v219_v45 = vld [vmem:[#allocation8 + $0x20] sm:$0xff]  ;;  %v218_v46 = vld [vmem:[#allocation8 + $0x18] sm:$0xff] }
  0x2e   :  { %201 = vmatpush.msra.mxu1 %v162_v17  ;;  %v217_v47 = vld [vmem:[#allocation8 + $0x10] sm:$0xff]  ;;  %v216_v48 = vld [vmem:[#allocation8 + $0x8] sm:$0xff]  ;;  %v215_v49 = vld [vmem:[#allocation8] sm:$0xff] }
  0x2f   :  { %182 = vmatpush.msra.mxu0 %v145_v19  ;;  %241 = vmatpush.msra.mxu2 %v224_v30  ;;  %v270_v50 = vld [vmem:[#allocation10 + $0x78] sm:$0xff]  ;;  %v269_v51 = vld [vmem:[#allocation10 + $0x70] sm:$0xff]  ;;  %v268_v52 = vld [vmem:[#allocation10 + $0x68] sm:$0xff] }
  0x30   :  { %202 = vmatpush.msra.mxu1 %v161_v20  ;;  %275 = vmatpush.msra.mxu3 %v270_v50  ;;  %v267_v53 = vld [vmem:[#allocation10 + $0x60] sm:$0xff]  ;;  %v266_v54 = vld [vmem:[#allocation10 + $0x58] sm:$0xff]  ;;  %v265_v55 = vld [vmem:[#allocation10 + $0x50] sm:$0xff] }
  0x31   :  { %183 = vmatpush.msra.mxu0 %v144_v21  ;;  %242 = vmatpush.msra.mxu2 %v223_v33  ;;  %v264_v56 = vld [vmem:[#allocation10 + $0x48] sm:$0xff]  ;;  %v263_v57 = vld [vmem:[#allocation10 + $0x40] sm:$0xff]  ;;  %v262_v58 = vld [vmem:[#allocation10 + $0x38] sm:$0xff] }
  0x32   :  { %203 = vmatpush.msra.mxu1 %v160_v23  ;;  %276 = vmatpush.msra.mxu3 %v269_v51  ;;  %v261_v59 = vld [vmem:[#allocation10 + $0x30] sm:$0xff]  ;;  %v260_v60 = vld [vmem:[#allocation10 + $0x28] sm:$0xff]  ;;  %v259_v61 = vld [vmem:[#allocation10 + $0x20] sm:$0xff] }
  0x33   :  { %184 = vmatpush.msra.mxu0 %v143_v25  ;;  %243 = vmatpush.msra.mxu2 %v222_v36  ;;  %v408_v62 = vld [vmem:[#allocation7] ss:$0 sm:$0xff]  ;;  %v257_v0 = vld [vmem:[#allocation10 + $0x10] sm:$0xff]  ;;  %v256_v6 = vld [vmem:[#allocation10 + $0x8] sm:$0xff] }
  0x34   :  { %204 = vmatpush.msra.mxu1 %v159_v26  ;;  %277 = vmatpush.msra.mxu3 %v268_v52  ;;  %v258_v63 = vld [vmem:[#allocation10 + $0x18] sm:$0xff]  ;;  %v255_v7 = vld [vmem:[#allocation10] sm:$0xff]  ;;  %v325_v11 = vld [vmem:[#allocation13 + $0xe8] sm:$0xff] }
  0x35   :  { %185 = vmatpush.msra.mxu0 %v142_v28  ;;  %244 = vmatpush.msra.mxu2 %v221_v39  ;;  %v326_v8 = vld [vmem:[#allocation13 + $0xf0] sm:$0xff]  ;;  %v327_v9 = vld [vmem:[#allocation13 + $0xf8] sm:$0xff]  ;;  %v324_v10 = vld [vmem:[#allocation13 + $0xe0] sm:$0xff] }
  0x36   :  { %205 = vmatpush.msra.mxu1 %v158_v29  ;;  %278 = vmatpush.msra.mxu3 %v267_v53  ;;  %v322_v12 = vld [vmem:[#allocation13 + $0xd0] sm:$0xff]  ;;  %v323_v13 = vld [vmem:[#allocation13 + $0xd8] sm:$0xff]  ;;  %v320_v14 = vld [vmem:[#allocation13 + $0xc0] sm:$0xff] }
  0x37   :  { %186 = vmatpush.msra.mxu0 %v141_v31  ;;  %245 = vmatpush.msra.mxu2 %v220_v44  ;;  %v321_v15 = vld [vmem:[#allocation13 + $0xc8] sm:$0xff]  ;;  %v318_v16 = vld [vmem:[#allocation13 + $0xb0] sm:$0xff]  ;;  %v319_v17 = vld [vmem:[#allocation13 + $0xb8] sm:$0xff] }
  0x38   :  { %206 = vmatpush.msra.mxu1 %v157_v32  ;;  %279 = vmatpush.msra.mxu3 %v266_v54  ;;  %v316_v18 = vld [vmem:[#allocation13 + $0xa0] sm:$0xff]  ;;  %v317_v19 = vld [vmem:[#allocation13 + $0xa8] sm:$0xff]  ;;  %v314_v20 = vld [vmem:[#allocation13 + $0x90] sm:$0xff] }
  0x39   :  { %187 = vmatpush.msra.mxu0 %v140_v34  ;;  %246 = vmatpush.msra.mxu2 %v219_v45  ;;  %v315_v21 = vld [vmem:[#allocation13 + $0x98] sm:$0xff]  ;;  %v312_v22 = vld [vmem:[#allocation13 + $0x80] sm:$0xff]  ;;  %v313_v23 = vld [vmem:[#allocation13 + $0x88] sm:$0xff] }
  0x3a   :  { %207 = vmatpush.msra.mxu1 %v156_v35  ;;  %280 = vmatpush.msra.mxu3 %v265_v55  ;;  %v310_v24 = vld [vmem:[#allocation13 + $0x70] sm:$0xff]  ;;  %v311_v25 = vld [vmem:[#allocation13 + $0x78] sm:$0xff]  ;;  %v308_v26 = vld [vmem:[#allocation13 + $0x60] sm:$0xff] }
  0x3b   :  { %188 = vmatpush.msra.mxu0 %v139_v37  ;;  %247 = vmatpush.msra.mxu2 %v218_v46  ;;  %v309_v27 = vld [vmem:[#allocation13 + $0x68] sm:$0xff]  ;;  %v306_v28 = vld [vmem:[#allocation13 + $0x50] sm:$0xff]  ;;  %v307_v29 = vld [vmem:[#allocation13 + $0x58] sm:$0xff] }
  0x3c   :  { %208 = vmatpush.msra.mxu1 %v155_v38  ;;  %281 = vmatpush.msra.mxu3 %v264_v56  ;;  %v304_v30 = vld [vmem:[#allocation13 + $0x40] sm:$0xff]  ;;  %v305_v31 = vld [vmem:[#allocation13 + $0x48] sm:$0xff]  ;;  %v302_v32 = vld [vmem:[#allocation13 + $0x30] sm:$0xff] }
  0x3d   :  { %189 = vmatpush.msra.mxu0 %v138_v40  ;;  %248 = vmatpush.msra.mxu2 %v217_v47  ;;  %v303_v33 = vld [vmem:[#allocation13 + $0x38] sm:$0xff]  ;;  %v409_v34 = vld [vmem:[%s718_s4] ss:$0 sm:$0xff]  ;;  %v300_v37 = vld [vmem:[#allocation13 + $0x20] sm:$0xff] }
  0x3e   :  { %209 = vmatpush.msra.mxu1 %v154_v41  ;;  %190 = vmatmul.f32.vlgmr.msra.gmra.mxu0 %v136_v42  ;;  %v301_v38 = vld [vmem:[#allocation13 + $0x28] sm:$0xff]  ;;  %v298_v39 = vld [vmem:[#allocation13 + $0x10] sm:$0xff]  ;;  %v299_v40 = vld [vmem:[#allocation13 + $0x18] sm:$0xff] }
  0x3f   :  { %210 = vmatmul.f32.vlgmr.msra.gmra.mxu1 %v137_v43  ;;  %249 = vmatpush.msra.mxu2 %v216_v48  ;;  %v296_v41 = vld [vmem:[#allocation13] sm:$0xff]  ;;  %v297_v42 = vld [vmem:[#allocation13 + $0x8] sm:$0xff]  ;;  %v410_v43 = vld [vmem:[#allocation11] ss:$0 sm:$0xff] }
  0x40   :  { %282 = vmatpush.msra.mxu3 %v263_v57  ;;  %334 = vmatpush.msrb.mxu0 %v326_v8  ;;  %v328_v47 = vld [vmem:[%s722_s8] sm:$0x3] }
  0x41   :  { %250 = vmatpush.msra.mxu2 %v215_v49  ;;  %354 = vmatpush.msrb.mxu1 %v327_v9  ;;  %v330_v48 = vperm.slane %v328_v47, 0  ;;  %v331_v49 = vperm.slane %v328_v47, 1 }
  0x42   :  { %283 = vmatpush.msra.mxu3 %v262_v58  ;;  %335 = vmatpush.msrb.mxu0 %v324_v10 }
  0x43   :  { %355 = vmatpush.msrb.mxu1 %v325_v11 }
  0x44   :  { %284 = vmatpush.msra.mxu3 %v261_v59  ;;  %336 = vmatpush.msrb.mxu0 %v322_v12 }
  0x45   :  { %356 = vmatpush.msrb.mxu1 %v323_v13 }
  0x46   :  { %285 = vmatpush.msra.mxu3 %v260_v60  ;;  %337 = vmatpush.msrb.mxu0 %v320_v14 }
  0x47   :  { %357 = vmatpush.msrb.mxu1 %v321_v15 }
  0x48   :  { %286 = vmatpush.msra.mxu3 %v259_v61  ;;  %338 = vmatpush.msrb.mxu0 %v318_v16 }
  0x49   :  { %358 = vmatpush.msrb.mxu1 %v319_v17 }
  0x4a   :  { %287 = vmatpush.msra.mxu3 %v258_v63  ;;  %339 = vmatpush.msrb.mxu0 %v316_v18 }
  0x4b   :  { %359 = vmatpush.msrb.mxu1 %v317_v19 }
  0x4c   :  { %288 = vmatpush.msra.mxu3 %v257_v0  ;;  %340 = vmatpush.msrb.mxu0 %v314_v20 }
  0x4d   :  { %360 = vmatpush.msrb.mxu1 %v315_v21 }
  0x4e   :  { %289 = vmatpush.msra.mxu3 %v256_v6  ;;  %341 = vmatpush.msrb.mxu0 %v312_v22 }
  0x4f   :  { %361 = vmatpush.msrb.mxu1 %v313_v23 }
  0x50   :  { %290 = vmatpush.msra.mxu3 %v255_v7  ;;  %342 = vmatpush.msrb.mxu0 %v310_v24 }
  0x51   :  { %362 = vmatpush.msrb.mxu1 %v311_v25 }
  0x52   :  { %343 = vmatpush.msrb.mxu0 %v308_v26 }
  0x53   :  { %363 = vmatpush.msrb.mxu1 %v309_v27 }
  0x54   :  { %344 = vmatpush.msrb.mxu0 %v306_v28 }
  0x55   :  { %364 = vmatpush.msrb.mxu1 %v307_v29 }
  0x56   :  { %345 = vmatpush.msrb.mxu0 %v304_v30 }
  0x57   :  { %365 = vmatpush.msrb.mxu1 %v305_v31 }
  0x58   :  { %346 = vmatpush.msrb.mxu0 %v302_v32 }
  0x59   :  { %366 = vmatpush.msrb.mxu1 %v303_v33 }
  0x5a   :  { %347 = vmatpush.msrb.mxu0 %v300_v37 }
  0x5b   :  { %367 = vmatpush.msrb.mxu1 %v301_v38 }
  0x5c   :  { %348 = vmatpush.msrb.mxu0 %v298_v39 }
  0x5d   :  { %368 = vmatpush.msrb.mxu1 %v299_v40 }
  0x5e   :  { %349 = vmatpush.msrb.mxu0 %v296_v41 }
  0x5f   :  { %369 = vmatpush.msrb.mxu1 %v297_v42 }
  0xbb   :  { %v191_v1 = vpop.f32.mrf.mxu0 }
  0xbc   :  { %v211_v2 = vpop.f32.mrf.mxu1  ;;  %v192_v3 = vadd.f32 %v408_v62, %v191_v1 }
  0xbe   :  { %v212_v4 = vadd.f32 %v211_v2, %v192_v3 }
  0xc0   :  { %v214_v5 = vmax.f32 %v212_v4, 0.0 }
  0xc2   :  { %251 = vmatmul.f32.vlgmr.msra.gmra.mxu2 %v214_v5 }
 0x145   :  { %v252_v35 = vpop.f32.mrf.mxu2 }
 0x146   :  { %v253_v36 = vadd.f32 %v409_v34, %v252_v35 }
 0x148   :  { %291 = vmatmul.f32.vlgmr.msra.gmra.mxu3 %v253_v36 }
 0x1cb   :  { %v292_v44 = vpop.f32.mrf.mxu3 }
 0x1cc   :  { %v293_v45 = vadd.f32 %v410_v43, %v292_v44 }
 0x1ce   :  { %v295_v46 = vmax.f32 %v293_v45, 0.0 }
 0x1d0   :  { %350 = vmatmul.f32.vlgmr.msrb.gmra.mxu0 %v295_v46  ;;  %370 = vmatmul.f32.vlgmr.msrb.gmra.mxu1 %v295_v46 }
 0x24d   :  { %v351_v50 = vpop.f32.mrf.mxu0  ;;  %v371_v51 = vpop.f32.mrf.mxu1 }
 0x24e   :  { %v352_v52 = vadd.f32 %v351_v50, %v330_v48  ;;  %v372_v53 = vadd.f32 %v371_v51, %v331_v49 }
 0x250   :  { %374 = vst [vmem:[#allocation14] sm:$0xff] %v352_v52 }
 0x251   :  { %375 = vst [vmem:[#allocation14 + $0x8] sm:$0xff] %v372_v53 }
 0x252   :  { %386 = dma.vmem_to_hbm [thread:$0]  %s382_s3, 256, %s384_s25, [#allocation4]  }
 0x253   :  { %611 = dma.done.wait [#allocation4], 256  }
 0x254   :  { %612 = vsyncadd [#allocation4], 4294967040 }
 0x255   :  { %391 = vsyncpa [#allocation3], 1 }
 0x256   :  { %392 = vsyncpa [#allocation6], 1 }
 0x257   :  { %393 = vsyncpa [#allocation9], 1 }
 0x258   :  { %394 = vsyncpa [#allocation12], 1 }
 0x259   :  { %395 = vsyncpa [#allocation4], 1 }

</bundles_post_ra>
